<compile_context>
chip_gen: v6e
topology: v6e:2x2x1
jax: 0.10.0
libtpu: 0.0.40
codegen_flags: <defaults>
</compile_context>

<pallas_src>
import jax
import jax.numpy as jnp
from jax.experimental import pallas as pl
from jax.experimental.pallas import tpu as pltpu

# SELU constants (match torch.nn.SELU)
_SELU_ALPHA = 1.6732632423543772
_SELU_SCALE = 1.0507009873554805

_VMEM_TILE_BUDGET = 24 << 20   # bytes of pipelined tiles we allow (under the 32 MiB limit)
_VMEM_LIMIT = 32 << 20         # scoped VMEM limit: fine on v5e/v6e (128 MiB) and v7x (64 MiB)


def _round_up(n, m):
    return ((n + m - 1) // m) * m


def _vanilla_kernel(x_ref, w1_ref, b1_ref, wd_ref, bd_ref, o_ref):
    # x: [TB, F], w1: [F, H], b1: [1, H], wd: [H, 1], bd: [1, 1], o: [TB, 2]
    x = x_ref[...]

    # Linear 1 (MXU matmul, f32 accumulate) + bias broadcast
    h = jnp.dot(x, w1_ref[...], preferred_element_type=jnp.float32) + b1_ref[...]

    # SELU (VPU elementwise + EUP exp); clamp exp arg so the dead branch / padded
    # partial-tile rows can't overflow.
    e = jnp.exp(jnp.minimum(h, 0.0))
    h = _SELU_SCALE * jnp.where(h > 0, h, _SELU_ALPHA * (e - 1.0))

    # Single-logit difference: d = logit_1 - logit_0  -> [TB, 1]
    d = jnp.dot(h, wd_ref[...], preferred_element_type=jnp.float32) + bd_ref[...]

    # Numerically-stable sigmoid: softmax([l0, l1])[1] == sigmoid(l1 - l0)
    ed = jnp.exp(-jnp.abs(d))
    p_small = ed / (1.0 + ed)                 # = sigmoid(-|d|)
    p1 = jnp.where(d >= 0, 1.0 - p_small, p_small)
    p0 = 1.0 - p1

    # Store both class probabilities directly into the (TB, 2) output block.
    o_ref[...] = jnp.concatenate([p0, p1], axis=1).astype(o_ref.dtype)


def _choose_tile(B, F, block_batch):
    """Pick the batch tile size: VMEM-aware, >=4 grid steps when B is large, multiple of 8."""
    lanes_f = _round_up(F, 128)
    # 2 double-buffered VMEM tiles per row: x (lanes_f lanes) + out (padded to 128 lanes), f32.
    per_row_bytes = 2 * 4 * (lanes_f + 128)
    tb_vmem = max(8, (_VMEM_TILE_BUDGET // per_row_bytes) // 8 * 8)
    tb_steps = max(8, _round_up((B + 3) // 4, 8))   # keep >=4 grid steps (megacore sharding)
    tb = min(block_batch, tb_vmem, _round_up(B, 8), tb_steps)
    return max(8, tb)


def vanilla_forward(x, w1, b1, w2, b2, *, block_batch=8192):
    """x: [B, F] f32; w1: [F, H]; b1: [1, H]; w2: [H, 2]; b2: [1, 2] -> softmax probs [B, 2]."""
    B, F = x.shape
    H = w1.shape[1]
    assert w1.shape == (F, H) and b1.shape == (1, H)
    assert w2.shape == (H, 2) and b2.shape == (1, 2)

    # Precompute the class-1 minus class-0 weight/bias difference (wrapper-side, one-off).
    wd = (w2[:, 1:2] - w2[:, 0:1]).astype(jnp.float32)   # [H, 1]
    bd = (b2[:, 1:2] - b2[:, 0:1]).astype(jnp.float32)   # [1, 1]

    tb = _choose_tile(B, F, block_batch)
    grid = (pl.cdiv(B, tb),)

    return pl.pallas_call(
        _vanilla_kernel,
        out_shape=jax.ShapeDtypeStruct((B, 2), jnp.float32),
        grid_spec=pltpu.PrefetchScalarGridSpec(
            num_scalar_prefetch=0,
            grid=grid,
            in_specs=[
                pl.BlockSpec((tb, F), lambda i: (i, 0)),   # x  : tiled over batch
                pl.BlockSpec((F, H), lambda i: (0, 0)),    # w1 : resident
                pl.BlockSpec((1, H), lambda i: (0, 0)),    # b1 : resident
                pl.BlockSpec((H, 1), lambda i: (0, 0)),    # wd : resident
                pl.BlockSpec((1, 1), lambda i: (0, 0)),    # bd : resident
            ],
            out_specs=pl.BlockSpec((tb, 2), lambda i: (i, 0)),
        ),
        compiler_params=pltpu.CompilerParams(
            dimension_semantics=("parallel",),
            vmem_limit_bytes=_VMEM_LIMIT,
        ),
    )(x, w1, b1, wd, bd)


def init_params(key, n_feats, num_nodes):
    """Deterministic init mimicking torch.nn.Linear default (uniform ±1/sqrt(fan_in))."""
    k1, k2, k3, k4 = jax.random.split(key, 4)
    bound1 = 1.0 / jnp.sqrt(n_feats)
    bound2 = 1.0 / jnp.sqrt(num_nodes)
    w1 = jax.random.uniform(k1, (n_feats, num_nodes), jnp.float32, -bound1, bound1)
    b1 = jax.random.uniform(k2, (1, num_nodes), jnp.float32, -bound1, bound1)
    w2 = jax.random.uniform(k3, (num_nodes, 2), jnp.float32, -bound2, bound2)
    b2 = jax.random.uniform(k4, (1, 2), jnp.float32, -bound2, bound2)
    return w1, b1, w2, b2


def _reference(x, w1, b1, w2, b2):
    h = x @ w1 + b1
    h = _SELU_SCALE * jnp.where(h > 0, h, _SELU_ALPHA * (jnp.exp(jnp.minimum(h, 0.0)) - 1.0))
    logits = h @ w2 + b2
    return jax.nn.softmax(logits, axis=1)


if __name__ == "__main__":
    n_feats, num_nodes = 32, 64
    key = jax.random.PRNGKey(0)
    kx, kp, kx2, kx3 = jax.random.split(key, 4)
    w1, b1, w2, b2 = init_params(kp, n_feats, num_nodes)

    # Small, sublane-aligned batch (single grid step).
    batch = 8
    x = jax.random.normal(kx, (batch, n_feats), jnp.float32)
    pred = jax.block_until_ready(vanilla_forward(x, w1, b1, w2, b2))
    ref = _reference(x, w1, b1, w2, b2)
    assert pred.shape == (batch, 2)
    assert jnp.allclose(pred, ref, atol=1e-5), "mismatch vs reference (batch=8)"

    # Ragged batch (exercises a partial last tile).
    batch2 = 50
    x2 = jax.random.normal(kx2, (batch2, n_feats), jnp.float32)
    pred2 = jax.block_until_ready(vanilla_forward(x2, w1, b1, w2, b2))
    ref2 = _reference(x2, w1, b1, w2, b2)
    assert pred2.shape == (batch2, 2)
    assert jnp.allclose(pred2, ref2, atol=1e-5), "mismatch vs reference (batch=50)"

    # Larger ragged batch (exercises the multi-step pipelined grid path).
    batch3 = 1000
    x3 = jax.random.normal(kx3, (batch3, n_feats), jnp.float32)
    pred3 = jax.block_until_ready(vanilla_forward(x3, w1, b1, w2, b2))
    ref3 = _reference(x3, w1, b1, w2, b2)
    assert pred3.shape == (batch3, 2)
    assert jnp.allclose(pred3, ref3, atol=1e-5), "mismatch vs reference (batch=1000)"

    print("KERNEL_OK")
</pallas_src>

<mosaic_0001>
module attributes {stable_mosaic.version = 11 : i64} {
  func.func @_vanilla_kernel(%arg0: i32, %arg1: memref<8x32xf32, #tpu.memory_space<vmem>>, %arg2: memref<32x64xf32, #tpu.memory_space<vmem>>, %arg3: memref<1x64xf32, #tpu.memory_space<vmem>>, %arg4: memref<64x1xf32, #tpu.memory_space<vmem>>, %arg5: memref<1x1xf32, #tpu.memory_space<vmem>>, %arg6: memref<8x2xf32, #tpu.memory_space<vmem>>) attributes {dimension_semantics = [#tpu.dimension_semantics<parallel>], iteration_bounds = array<i64: 1>, scalar_prefetch = 0 : i64, scratch_operands = 0 : i64, tpu.core_type = #tpu.core_type<tc>, window_params = [{transform_indices = @transform_0, window_bounds = array<i64: 8, 32>}, {pipeline_mode = #tpu.pipeline_mode<synchronous>, transform_indices = @transform_1, window_bounds = array<i64: 32, 64>}, {pipeline_mode = #tpu.pipeline_mode<synchronous>, transform_indices = @transform_2, window_bounds = array<i64: 1, 64>}, {pipeline_mode = #tpu.pipeline_mode<synchronous>, transform_indices = @transform_3, window_bounds = array<i64: 64, 1>}, {pipeline_mode = #tpu.pipeline_mode<synchronous>, transform_indices = @transform_4, window_bounds = array<i64: 1, 1>}, {transform_indices = @transform_5, window_bounds = array<i64: 8, 2>}]} {
    %c0 = arith.constant 0 : index
    %c0_0 = arith.constant 0 : index
    %0 = vector.load %arg1[%c0, %c0_0] : memref<8x32xf32, #tpu.memory_space<vmem>>, vector<8x32xf32>
    %c0_1 = arith.constant 0 : index
    %c0_2 = arith.constant 0 : index
    %1 = vector.load %arg2[%c0_1, %c0_2] : memref<32x64xf32, #tpu.memory_space<vmem>>, vector<32x64xf32>
    %cst = arith.constant dense<0.000000e+00> : vector<8x64xf32>
    %2 = tpu.matmul %0, %1, %cst {dimension_numbers = #tpu.dot_dimension_numbers<[1], [0], [0], [1], [0, 0, 1, 1], [], []>} : vector<8x32xf32>, vector<32x64xf32>, vector<8x64xf32> -> vector<8x64xf32>
    %c0_3 = arith.constant 0 : index
    %c0_4 = arith.constant 0 : index
    %3 = vector.load %arg3[%c0_3, %c0_4] : memref<1x64xf32, #tpu.memory_space<vmem>>, vector<1x64xf32>
    %4 = vector.broadcast %3 : vector<1x64xf32> to vector<8x64xf32>
    %5 = arith.addf %2, %4 : vector<8x64xf32>
    %cst_5 = arith.constant 0.000000e+00 : f32
    %6 = vector.broadcast %cst_5 : f32 to vector<8x64xf32>
    %7 = arith.minimumf %5, %6 : vector<8x64xf32>
    %8 = math.exp %7 : vector<8x64xf32>
    %cst_6 = arith.constant 0.000000e+00 : f32
    %9 = vector.broadcast %cst_6 : f32 to vector<8x64xf32>
    %10 = arith.cmpf ogt, %5, %9 : vector<8x64xf32>
    %cst_7 = arith.constant 1.000000e+00 : f32
    %11 = vector.broadcast %cst_7 : f32 to vector<8x64xf32>
    %12 = arith.subf %8, %11 : vector<8x64xf32>
    %cst_8 = arith.constant 1.67326319 : f32
    %13 = vector.broadcast %cst_8 : f32 to vector<8x64xf32>
    %14 = arith.mulf %13, %12 : vector<8x64xf32>
    %15 = arith.select %10, %5, %14 : vector<8x64xi1>, vector<8x64xf32>
    %cst_9 = arith.constant 1.05070102 : f32
    %16 = vector.broadcast %cst_9 : f32 to vector<8x64xf32>
    %17 = arith.mulf %16, %15 : vector<8x64xf32>
    %c0_10 = arith.constant 0 : index
    %c0_11 = arith.constant 0 : index
    %18 = vector.load %arg4[%c0_10, %c0_11] : memref<64x1xf32, #tpu.memory_space<vmem>>, vector<64x1xf32>
    %cst_12 = arith.constant dense<0.000000e+00> : vector<8x1xf32>
    %19 = tpu.matmul %17, %18, %cst_12 {dimension_numbers = #tpu.dot_dimension_numbers<[1], [0], [0], [1], [0, 0, 1, 1], [], []>} : vector<8x64xf32>, vector<64x1xf32>, vector<8x1xf32> -> vector<8x1xf32>
    %c0_13 = arith.constant 0 : index
    %c0_14 = arith.constant 0 : index
    %20 = vector.load %arg5[%c0_13, %c0_14] : memref<1x1xf32, #tpu.memory_space<vmem>>, vector<1x1xf32>
    %21 = vector.broadcast %20 : vector<1x1xf32> to vector<8x1xf32>
    %22 = arith.addf %19, %21 : vector<8x1xf32>
    %23 = math.absf %22 : vector<8x1xf32>
    %cst_15 = arith.constant 0.000000e+00 : f32
    %24 = vector.broadcast %cst_15 : f32 to vector<8x1xf32>
    %25 = arith.subf %24, %23 : vector<8x1xf32>
    %26 = math.exp %25 : vector<8x1xf32>
    %cst_16 = arith.constant 1.000000e+00 : f32
    %27 = vector.broadcast %cst_16 : f32 to vector<8x1xf32>
    %28 = arith.addf %27, %26 : vector<8x1xf32>
    %29 = arith.divf %26, %28 : vector<8x1xf32>
    %cst_17 = arith.constant 0.000000e+00 : f32
    %30 = vector.broadcast %cst_17 : f32 to vector<8x1xf32>
    %31 = arith.cmpf oge, %22, %30 : vector<8x1xf32>
    %cst_18 = arith.constant 1.000000e+00 : f32
    %32 = vector.broadcast %cst_18 : f32 to vector<8x1xf32>
    %33 = arith.subf %32, %29 : vector<8x1xf32>
    %34 = arith.select %31, %33, %29 : vector<8x1xi1>, vector<8x1xf32>
    %cst_19 = arith.constant 1.000000e+00 : f32
    %35 = vector.broadcast %cst_19 : f32 to vector<8x1xf32>
    %36 = arith.subf %35, %34 : vector<8x1xf32>
    %37 = tpu.concatenate %36, %34 in 1 : vector<8x1xf32>, vector<8x1xf32> -> vector<8x2xf32>
    %c0_20 = arith.constant 0 : index
    %c0_21 = arith.constant 0 : index
    %38 = vector.load %arg6[%c0_20, %c0_21] : memref<8x2xf32, #tpu.memory_space<vmem>>, vector<8x2xf32>
    tpu.vector_store %arg6[%c0_20, %c0_21], %37 {strides = array<i32>} : memref<8x2xf32, #tpu.memory_space<vmem>>, vector<8x2xf32>,
    return
  }
  func.func @transform_0(%arg0: i32) -> (i32, i32) {
    %c0_i32 = arith.constant 0 : i32
    %c0_i32_0 = arith.constant 0 : i32
    return %arg0, %c0_i32 : i32, i32
  }
  func.func @transform_1(%arg0: i32) -> (i32, i32) {
    %c0_i32 = arith.constant 0 : i32
    %c0_i32_0 = arith.constant 0 : i32
    %c0_i32_1 = arith.constant 0 : i32
    return %c0_i32, %c0_i32_0 : i32, i32
  }
  func.func @transform_2(%arg0: i32) -> (i32, i32) {
    %c0_i32 = arith.constant 0 : i32
    %c0_i32_0 = arith.constant 0 : i32
    %c0_i32_1 = arith.constant 0 : i32
    return %c0_i32, %c0_i32_0 : i32, i32
  }
  func.func @transform_3(%arg0: i32) -> (i32, i32) {
    %c0_i32 = arith.constant 0 : i32
    %c0_i32_0 = arith.constant 0 : i32
    %c0_i32_1 = arith.constant 0 : i32
    return %c0_i32, %c0_i32_0 : i32, i32
  }
  func.func @transform_4(%arg0: i32) -> (i32, i32) {
    %c0_i32 = arith.constant 0 : i32
    %c0_i32_0 = arith.constant 0 : i32
    %c0_i32_1 = arith.constant 0 : i32
    return %c0_i32, %c0_i32_0 : i32, i32
  }
  func.func @transform_5(%arg0: i32) -> (i32, i32) {
    %c0_i32 = arith.constant 0 : i32
    %c0_i32_0 = arith.constant 0 : i32
    return %arg0, %c0_i32 : i32, i32
  }
}

</mosaic_0001>

<bundles_post_ra>
// kernel: tpu_custom_call.1
= control target key start
LH: loop header
LB: loop body
LE: loop exit
PB: predicated region body
PF: predicated region fallthrough
CT: control target
= control target key end

     0   :  { %v286_v0 = vmov 0.0   ;;  %vm287_vm0 = vmmov 0   ;;  %vm34_vm1 = vcmask 261120   ;;  %vm131_vm3 = vcmask 523264   ;;  %s367_s1 = inlined_call_operand.vmem [shape: f32[32,64], index: 1, kind: input, shape index: {}]   ;;  %s368_s0 = inlined_call_operand.vmem [shape: f32[8,32], index: 0, kind: input, shape index: {}]   ;;  %s369_s3 = inlined_call_operand.vmem [shape: f32[64,1], index: 3, kind: input, shape index: {}]   ;;  %s370_s4 = inlined_call_operand.<no memory space> [shape: f32[1,1], index: 4, kind: input, shape index: {}]   ;;  %s371_s2 = inlined_call_operand.vmem [shape: f32[1,64], index: 2, kind: input, shape index: {}]   ;;  %s372_s5 = inlined_call_operand.vmem [shape: f32[8,2], index: 5, kind: output, shape index: {}]  }
   0x1   :  { %247 = vmatprep.subr.mxu0 %v286_v0  ;;  %v26_v1 = vld [vmem:[%s367_s1 + $0x18] sm:$0xff]  ;;  %v25_v2 = vld [vmem:[%s367_s1 + $0x10] sm:$0xff]  ;;  %255 = vmatprep.mubr.msk.f32.mxu0 %vm287_vm0, %v286_v0  ;;  %v24_v3 = vld [vmem:[%s367_s1 + $0x8] sm:$0xff]  ;;  %v10_v14 = vstv %s370_s4  ;;  %vm220_vm5 = vcmask 7168   ;;  %vm222_vm6 = vcmask 15360  }
   0x2   :  { %248 = vmatpush3.msra.mxu0 %v26_v1  ;;  %258 = vmatprep.subr.mxu1 %v286_v0  ;;  %v23_v4 = vld [vmem:[%s367_s1] sm:$0xff]  ;;  %v123_v6 = vld [vmem:[%s369_s3 + $0x38] sm:$0xff]  ;;  %v122_v7 = vld [vmem:[%s369_s3 + $0x30] sm:$0xff]  ;;  %11 = vst [vmem:[#allocation2] sm:$0x1] %v10_v14 }
   0x3   :  { %249 = vmatprep.subr.mxu0 %v286_v0  ;;  %274 = vmatprep.mubr.msk.f32.mxu1 %vm287_vm0, %v286_v0  ;;  %v22_v5 = vld [vmem:[%s368_s0] sm:$0xff]  ;;  %v121_v8 = vld [vmem:[%s369_s3 + $0x28] sm:$0xff]  ;;  %v119_v10 = vld [vmem:[%s369_s3 + $0x18] sm:$0xff] }
   0x4   :  { %250 = vmatpush3.msra.mxu0 %v25_v2  ;;  %259 = vmatpush3.msra.mxu1 %v123_v6  ;;  %v120_v9 = vld [vmem:[%s369_s3 + $0x20] sm:$0xff]  ;;  %v118_v11 = vld [vmem:[%s369_s3 + $0x10] sm:$0xff]  ;;  %v117_v12 = vld [vmem:[%s369_s3 + $0x8] sm:$0xff] }
   0x5   :  { %251 = vmatprep.subr.mxu0 %v286_v0  ;;  %260 = vmatprep.subr.mxu1 %v286_v0  ;;  %v116_v13 = vld [vmem:[%s369_s3] sm:$0xff] }
   0x6   :  { %252 = vmatpush3.msra.mxu0 %v24_v3  ;;  %261 = vmatpush3.msra.mxu1 %v122_v7  ;;  %v228_v15 = vld [vmem:[%s371_s2] ss:$0 sm:$0xff]  ;;  %s288_s2 = smov 1  }
   0x7   :  { %253 = vmatprep.subr.mxu0 %v286_v0  ;;  %262 = vmatprep.subr.mxu1 %v286_v0 }
   0x8   :  { %254 = vmatpush3.msra.mxu0 %v23_v4  ;;  %263 = vmatpush3.msra.mxu1 %v121_v8 }
   0x9   :  { %256 = vmatmul.mubr.msk.f32.vlgmr.msra.gmra.mxu0 %vm34_vm1, %v22_v5  ;;  %264 = vmatprep.subr.mxu1 %v286_v0  ;;  %v231_v26 = vld [vmem:[#allocation2] ss:$0 sm:$0xff] }
   0xa   :  { %265 = vmatpush3.msra.mxu1 %v120_v9 }
   0xb   :  { %266 = vmatprep.subr.mxu1 %v286_v0 }
   0xc   :  { %267 = vmatpush3.msra.mxu1 %v119_v10 }
   0xd   :  { %268 = vmatprep.subr.mxu1 %v286_v0 }
   0xe   :  { %269 = vmatpush3.msra.mxu1 %v118_v11 }
   0xf   :  { %270 = vmatprep.subr.mxu1 %v286_v0 }
  0x10   :  { %271 = vmatpush3.msra.mxu1 %v117_v12 }
  0x11   :  { %272 = vmatprep.subr.mxu1 %v286_v0 }
  0x12   :  { %273 = vmatpush3.msra.mxu1 %v116_v13 }
  0xc9   :  { %v104_v16 = vpop.f32.mrf.mxu0 }
  0xca   :  { %v105_v17 = vadd.f32 %v228_v15, %v104_v16 }
  0xcb   :  { %v257_v18 = vpop.f32.mrf.mxu0 }
  0xcc   :  { %v108_v19 = vmin.f32 %v105_v17, 0.0  ;;  %vm111_vm2 = vcmp.gt.f32.partialorder %v105_v17, 0.0 }
  0xce   :  { %v109_v20 = vmul.f32 1.442695, %v108_v19 }
  0xd0   :  { %280 = vpow2.f32 %v109_v20 }
  0xdd   :  { %v281_v21 = vpop.eup %280 }
  0xde   :  { %v230_v22 = vadd.f32 -1.0, %v281_v21 }
  0xe0   :  { %v113_v23 = vmul.f32 1.6732632, %v230_v22 }
  0xe2   :  { %v114_v24 = vsel %vm111_vm2, %v105_v17, %v113_v23 }
  0xe3   :  { %v115_v25 = vmul.f32 1.050701, %v114_v24 }
  0xe5   :  { %275 = vmatmul.mubr.msk.f32.vlgmr.msra.gmra.mxu1 %vm131_vm3, %v115_v25 }
 0x1a5   :  { %v201_v27 = vpop.f32.mrf.mxu1 }
 0x1a6   :  { %v202_v28 = vadd.f32 %v231_v26, %v201_v27 }
 0x1a7   :  { %v276_v29 = vpop.f32.mrf.mxu1 }
 0x1a8   :  { %v205_v30 = vand.u32 2147483647, %v202_v28  ;;  %vm212_vm4 = vcmp.ge.f32.partialorder %v202_v28, 0.0 }
 0x1aa   :  { %v206_v31 = vsub.f32 0.0, %v205_v30 }
 0x1ac   :  { %v207_v32 = vmul.f32 1.442695, %v206_v31 }
 0x1ae   :  { %282 = vpow2.f32 %v207_v32 }
 0x1bb   :  { %v283_v33 = vpop.eup %282 }
 0x1bc   :  { %v209_v34 = vadd.f32 1.0, %v283_v33 }
 0x1be   :  { %284 = vrcp.f32 %v209_v34 }
 0x1cb   :  { %v285_v35 = vpop.eup %284 }
 0x1cc   :  { %v211_v36 = vmul.f32 %v285_v35, %v283_v33 }
 0x1ce   :  { %v213_v37 = vsub.f32 1.0, %v211_v36 }
 0x1d0   :  { %v214_v38 = vsel %vm212_vm4, %v213_v37, %v211_v36 }
 0x1d1   :  { %217 = vrot.lane.b32.xlu0 %v214_v38, %s288_s2  ;;  %v215_v39 = vsub.f32 1.0, %v214_v38 }
 0x243   :  { %v218_v40 = vpop.permute.xlu0 %217 }
 0x244   :  { %v221_v41 = vsel %vm220_vm5, %v215_v39, %v218_v40 }
 0x245   :  { %223 = vst.msk [vmem:[%s372_s5] sm:$0xff] %vm222_vm6, %v221_v41 }

</bundles_post_ra>
